<compile_context>
chip_gen: v7x
topology: tpu7x:2x2x1
jax: 0.10.0
libtpu: 0.0.40
codegen_flags: <defaults>
</compile_context>

<pallas_src>
import functools

import jax
import jax.numpy as jnp
from jax.experimental import pallas as pl
from jax.experimental.pallas import tpu as pltpu

_LANES = 128
_BUDGET_BYTES = 32 * 1024 * 1024  # target double-buffered streaming working set


def _lane_pad(c: int) -> int:
    return ((c + _LANES - 1) // _LANES) * _LANES


def _choose_block_b(B: int, C: int, itemsize: int) -> int:
    # VMEM bytes per batch row: lane-padded logits tile + lane-padded int32 target tile.
    bytes_per_row = _lane_pad(C) * itemsize + _LANES * 4
    rows = _BUDGET_BYTES // (2 * bytes_per_row)  # 2x: BlockSpec double-buffers inputs
    rows = max(8, (rows // 8) * 8)
    return B if rows >= B else int(rows)


def make_label_smoothing_kernel(smoothing: float, total_rows: int, block_rows: int):
    confidence = 1.0 - smoothing
    needs_mask = (total_rows % block_rows) != 0

    def kernel(x_ref, tgt_ref, cw_ref, out_ref):
        i = pl.program_id(0)

        x = x_ref[...].astype(jnp.float32)      # [TB, C] logits (f32 math)
        tgt = tgt_ref[...]                      # [TB, 1] int32
        cw = cw_ref[...].astype(jnp.float32)    # [1, C] class weights (resident)
        TB, C = x.shape

        if needs_mask:
            row = jax.lax.broadcasted_iota(jnp.int32, (TB, 1), 0)
            valid = (i * block_rows + row) < total_rows
            x = jnp.where(valid, x, 0.0)        # keep garbage OOB rows finite

        # Stable log-sum-exp along the class (lane) axis; logp is never materialized.
        m = jnp.max(x, axis=-1, keepdims=True)                              # [TB, 1]
        lse = m + jnp.log(jnp.sum(jnp.exp(x - m), axis=-1, keepdims=True))  # [TB, 1]

        # Gather x[target] and class_loss_weight[target] via selects (no f32 one-hot,
        # no materialized (TB, C) class-weight broadcast).
        col = jax.lax.broadcasted_iota(jnp.int32, (TB, C), 1)               # [TB, C]
        is_t = col == tgt                                                   # [TB, C] bool
        x_t = jnp.sum(jnp.where(is_t, x, 0.0), axis=-1, keepdims=True)      # [TB, 1]
        w = jnp.sum(jnp.where(is_t, cw, 0.0), axis=-1, keepdims=True)       # [TB, 1]

        nll = lse - x_t                                                     # -logp[target]
        smooth = lse - jnp.sum(x, axis=-1, keepdims=True) * (1.0 / C)       # -mean(logp)
        loss = confidence * nll * w + smoothing * smooth                    # [TB, 1]

        if needs_mask:
            loss = jnp.where(valid, loss, 0.0)
            w = jnp.where(valid, w, 0.0)

        num = jnp.sum(loss, axis=0, keepdims=True)   # (1, 1) per-tile loss sum
        den = jnp.sum(w, axis=0, keepdims=True)      # (1, 1) per-tile weight sum

        # Lane-dense partial write: lane 0 = loss sum, lane 1 = weight sum, rest 0.
        lane = jax.lax.broadcasted_iota(jnp.int32, (1, _LANES), 1)
        row_out = jnp.where(lane == 0, num, 0.0) + jnp.where(lane == 1, den, 0.0)
        out_ref[...] = row_out.reshape(1, 1, _LANES)

    return kernel


@functools.partial(jax.jit, static_argnames=("smoothing", "block_b"))
def label_smoothing_loss(x, target, class_loss_weight, smoothing=0.05, block_b=None):
    """x: [B, C] logits (f32/bf16); target: [B] int; class_loss_weight: [C] f32."""
    B, C = x.shape
    itemsize = x.dtype.itemsize
    if block_b is None:
        block_b = _choose_block_b(B, C, itemsize)
    assert block_b == B or block_b % 8 == 0, "batch tile must be B or a multiple of 8"

    tgt2d = target.astype(jnp.int32).reshape(B, 1)
    cw2d = class_loss_weight.astype(jnp.float32).reshape(1, C)

    num_tiles = pl.cdiv(B, block_b)
    kernel = make_label_smoothing_kernel(smoothing, B, block_b)

    # VMEM footprint: double-buffered (lane-padded) logits + target tiles, resident
    # class-weight row, double-buffered output block. Add headroom, keep under v7x's
    # 64 MiB physical VMEM.
    c_pad = _lane_pad(C)
    per_step = block_b * c_pad * itemsize + block_b * _LANES * 4
    footprint = 2 * per_step + 2 * c_pad * 4 + 2 * _LANES * 4
    vmem_limit = int(min(max(footprint + (8 << 20), 16 << 20), 56 << 20))

    partials = pl.pallas_call(
        kernel,
        out_shape=jax.ShapeDtypeStruct((num_tiles, 1, _LANES), jnp.float32),
        grid_spec=pltpu.PrefetchScalarGridSpec(
            num_scalar_prefetch=0,
            grid=(num_tiles,),
            in_specs=[
                pl.BlockSpec((block_b, C), lambda i: (i, 0)),   # logits, native dtype
                pl.BlockSpec((block_b, 1), lambda i: (i, 0)),   # targets (int32)
                pl.BlockSpec((1, C), lambda i: (0, 0)),         # class weights (resident)
            ],
            out_specs=pl.BlockSpec((1, 1, _LANES), lambda i: (i, 0, 0)),
        ),
        compiler_params=pltpu.CompilerParams(
            dimension_semantics=("parallel",),
            vmem_limit_bytes=vmem_limit,
        ),
    )(x, tgt2d, cw2d)

    loss_sum = jnp.sum(partials[:, 0, 0])
    w_sum = jnp.sum(partials[:, 0, 1])
    # NOTE: no guard against sum(w) == 0, matching the PyTorch original.
    return loss_sum / w_sum


def _reference(x, target, class_loss_weight, smoothing=0.05):
    confidence = 1.0 - smoothing
    logp = jax.nn.log_softmax(x.astype(jnp.float32), axis=-1)
    nll = -jnp.take_along_axis(logp, target[:, None], axis=-1)[:, 0]
    smooth = -jnp.mean(logp, axis=-1)
    w = class_loss_weight[target]
    loss = confidence * nll * w + smoothing * smooth
    return jnp.sum(loss) / jnp.sum(w)


if __name__ == "__main__":
    key = jax.random.PRNGKey(0)

    ok = True
    # (batch, classes, dtype, forced batch tile):
    #   single-tile / multi-tile / ragged last tile / wider class axis / bf16 streaming.
    cases = [
        (8, 16, jnp.float32, None),
        (24, 16, jnp.float32, 8),
        (20, 16, jnp.float32, 8),
        (32, 256, jnp.float32, None),
        (24, 16, jnp.bfloat16, 8),
    ]
    for B, C, dtype, blk in cases:
        kx, kt, kw, key = jax.random.split(key, 4)
        x = jax.random.normal(kx, (B, C), dtype=jnp.float32).astype(dtype)
        target = jax.random.randint(kt, (B,), 0, C, dtype=jnp.int32)
        class_loss_weight = jax.random.uniform(kw, (C,), jnp.float32, 0.5, 1.5)

        out = label_smoothing_loss(x, target, class_loss_weight,
                                   smoothing=0.05, block_b=blk)
        out = jax.block_until_ready(out)
        ref = _reference(x, target, class_loss_weight, smoothing=0.05)
        tol = 1e-5 if dtype == jnp.float32 else 1e-4
        if not jnp.allclose(out, ref, rtol=tol, atol=tol):
            ok = False
            print("MISMATCH", B, C, dtype, blk, out, ref)

    if ok:
        print("KERNEL_OK")
</pallas_src>

<mosaic_0001>
module attributes {stable_mosaic.version = 11 : i64} {
  func.func @kernel(%arg0: i32, %arg1: memref<8x16xf32, #tpu.memory_space<vmem>>, %arg2: memref<8x1xi32, #tpu.memory_space<vmem>>, %arg3: memref<1x16xf32, #tpu.memory_space<vmem>>, %arg4: memref<1x1x128xf32, #tpu.memory_space<vmem>>) attributes {dimension_semantics = [#tpu.dimension_semantics<parallel>], iteration_bounds = array<i64: 1>, scalar_prefetch = 0 : i64, scratch_operands = 0 : i64, tpu.core_type = #tpu.core_type<tc>, window_params = [{transform_indices = @transform_0, window_bounds = array<i64: 8, 16>}, {transform_indices = @transform_1, window_bounds = array<i64: 8, 1>}, {pipeline_mode = #tpu.pipeline_mode<synchronous>, transform_indices = @transform_2, window_bounds = array<i64: 1, 16>}, {transform_indices = @transform_3, window_bounds = array<i64: 1, 1, 128>}]} {
    %c0 = arith.constant 0 : index
    %c0_0 = arith.constant 0 : index
    %0 = vector.load %arg1[%c0, %c0_0] : memref<8x16xf32, #tpu.memory_space<vmem>>, vector<8x16xf32>
    %c0_1 = arith.constant 0 : index
    %c0_2 = arith.constant 0 : index
    %1 = vector.load %arg2[%c0_1, %c0_2] : memref<8x1xi32, #tpu.memory_space<vmem>>, vector<8x1xi32>
    %c0_3 = arith.constant 0 : index
    %c0_4 = arith.constant 0 : index
    %2 = vector.load %arg3[%c0_3, %c0_4] : memref<1x16xf32, #tpu.memory_space<vmem>>, vector<1x16xf32>
    %cst = arith.constant dense<0xFF800000> : vector<8xf32>
    %3 = vector.multi_reduction <maximumf>, %0, %cst [1] : vector<8x16xf32> to vector<8xf32>
    %4 = vector.shape_cast %3 : vector<8xf32> to vector<8x1xf32>
    %5 = vector.broadcast %4 : vector<8x1xf32> to vector<8x16xf32>
    %6 = arith.subf %0, %5 : vector<8x16xf32>
    %7 = math.exp %6 : vector<8x16xf32>
    %cst_5 = arith.constant dense<0.000000e+00> : vector<8xf32>
    %8 = vector.multi_reduction <add>, %7, %cst_5 [1] : vector<8x16xf32> to vector<8xf32>
    %9 = vector.shape_cast %8 : vector<8xf32> to vector<8x1xf32>
    %10 = math.log %9 : vector<8x1xf32>
    %11 = arith.addf %4, %10 : vector<8x1xf32>
    %12 = tpu.iota {dimensions = array<i32: 1>} : vector<8x16xi32>
    %13 = vector.broadcast %1 : vector<8x1xi32> to vector<8x16xi32>
    %14 = arith.cmpi eq, %12, %13 : vector<8x16xi32>
    %cst_6 = arith.constant 0.000000e+00 : f32
    %15 = vector.broadcast %cst_6 : f32 to vector<8x16xf32>
    %16 = arith.select %14, %0, %15 : vector<8x16xi1>, vector<8x16xf32>
    %cst_7 = arith.constant dense<0.000000e+00> : vector<8xf32>
    %17 = vector.multi_reduction <add>, %16, %cst_7 [1] : vector<8x16xf32> to vector<8xf32>
    %18 = vector.shape_cast %17 : vector<8xf32> to vector<8x1xf32>
    %cst_8 = arith.constant 0.000000e+00 : f32
    %19 = vector.shape_cast %2 : vector<1x16xf32> to vector<1x16xf32>
    %20 = vector.broadcast %19 : vector<1x16xf32> to vector<8x16xf32>
    %21 = vector.broadcast %cst_8 : f32 to vector<8x16xf32>
    %22 = arith.select %14, %20, %21 : vector<8x16xi1>, vector<8x16xf32>
    %cst_9 = arith.constant dense<0.000000e+00> : vector<8xf32>
    %23 = vector.multi_reduction <add>, %22, %cst_9 [1] : vector<8x16xf32> to vector<8xf32>
    %24 = vector.shape_cast %23 : vector<8xf32> to vector<8x1xf32>
    %25 = arith.subf %11, %18 : vector<8x1xf32>
    %cst_10 = arith.constant dense<0.000000e+00> : vector<8xf32>
    %26 = vector.multi_reduction <add>, %0, %cst_10 [1] : vector<8x16xf32> to vector<8xf32>
    %27 = vector.shape_cast %26 : vector<8xf32> to vector<8x1xf32>
    %cst_11 = arith.constant 6.250000e-02 : f32
    %28 = vector.broadcast %cst_11 : f32 to vector<8x1xf32>
    %29 = arith.mulf %27, %28 : vector<8x1xf32>
    %30 = arith.subf %11, %29 : vector<8x1xf32>
    %cst_12 = arith.constant 0.949999988 : f32
    %31 = vector.broadcast %cst_12 : f32 to vector<8x1xf32>
    %32 = arith.mulf %31, %25 : vector<8x1xf32>
    %33 = arith.mulf %32, %24 : vector<8x1xf32>
    %cst_13 = arith.constant 5.000000e-02 : f32
    %34 = vector.broadcast %cst_13 : f32 to vector<8x1xf32>
    %35 = arith.mulf %34, %30 : vector<8x1xf32>
    %36 = arith.addf %33, %35 : vector<8x1xf32>
    %cst_14 = arith.constant dense<0.000000e+00> : vector<1xf32>
    %37 = vector.multi_reduction <add>, %36, %cst_14 [0] : vector<8x1xf32> to vector<1xf32>
    %38 = vector.shape_cast %37 : vector<1xf32> to vector<1x1xf32>
    %cst_15 = arith.constant dense<0.000000e+00> : vector<1xf32>
    %39 = vector.multi_reduction <add>, %24, %cst_15 [0] : vector<8x1xf32> to vector<1xf32>
    %40 = vector.shape_cast %39 : vector<1xf32> to vector<1x1xf32>
    %41 = tpu.iota {dimensions = array<i32: 1>} : vector<1x128xi32>
    %c0_i32 = arith.constant 0 : i32
    %42 = vector.broadcast %c0_i32 : i32 to vector<1x128xi32>
    %43 = arith.cmpi eq, %41, %42 : vector<1x128xi32>
    %cst_16 = arith.constant 0.000000e+00 : f32
    %44 = vector.shape_cast %38 : vector<1x1xf32> to vector<1x1xf32>
    %45 = vector.broadcast %44 : vector<1x1xf32> to vector<1x128xf32>
    %46 = vector.broadcast %cst_16 : f32 to vector<1x128xf32>
    %47 = arith.select %43, %45, %46 : vector<1x128xi1>, vector<1x128xf32>
    %c1_i32 = arith.constant 1 : i32
    %48 = vector.broadcast %c1_i32 : i32 to vector<1x128xi32>
    %49 = arith.cmpi eq, %41, %48 : vector<1x128xi32>
    %cst_17 = arith.constant 0.000000e+00 : f32
    %50 = vector.shape_cast %40 : vector<1x1xf32> to vector<1x1xf32>
    %51 = vector.broadcast %50 : vector<1x1xf32> to vector<1x128xf32>
    %52 = vector.broadcast %cst_17 : f32 to vector<1x128xf32>
    %53 = arith.select %49, %51, %52 : vector<1x128xi1>, vector<1x128xf32>
    %54 = arith.addf %47, %53 : vector<1x128xf32>
    %55 = vector.shape_cast %54 : vector<1x128xf32> to vector<1x1x128xf32>
    %c0_18 = arith.constant 0 : index
    %c0_19 = arith.constant 0 : index
    %c0_20 = arith.constant 0 : index
    %56 = vector.load %arg4[%c0_18, %c0_19, %c0_20] : memref<1x1x128xf32, #tpu.memory_space<vmem>>, vector<1x1x128xf32>
    tpu.vector_store %arg4[%c0_18, %c0_19, %c0_20], %55 {strides = array<i32>} : memref<1x1x128xf32, #tpu.memory_space<vmem>>, vector<1x1x128xf32>,
    return
  }
  func.func @transform_0(%arg0: i32) -> (i32, i32) {
    %c0_i32 = arith.constant 0 : i32
    %c0_i32_0 = arith.constant 0 : i32
    return %arg0, %c0_i32 : i32, i32
  }
  func.func @transform_1(%arg0: i32) -> (i32, i32) {
    %c0_i32 = arith.constant 0 : i32
    %c0_i32_0 = arith.constant 0 : i32
    return %arg0, %c0_i32 : i32, i32
  }
  func.func @transform_2(%arg0: i32) -> (i32, i32) {
    %c0_i32 = arith.constant 0 : i32
    %c0_i32_0 = arith.constant 0 : i32
    %c0_i32_1 = arith.constant 0 : i32
    return %c0_i32, %c0_i32_0 : i32, i32
  }
  func.func @transform_3(%arg0: i32) -> (i32, i32, i32) {
    %c0_i32 = arith.constant 0 : i32
    %c0_i32_0 = arith.constant 0 : i32
    %c0_i32_1 = arith.constant 0 : i32
    return %arg0, %c0_i32, %c0_i32_0 : i32, i32, i32
  }
}

</mosaic_0001>

<bundles_post_ra>
// kernel: label_smoothing_loss.1
= control target key start
LH: loop header
LB: loop body
LE: loop exit
PB: predicated region body
PF: predicated region fallthrough
CT: control target
= control target key end

     0   :  { %vm17_vm0 = vcmask 130048   ;;  %v89_v1 = vmov 0   ;;  %v30_v7 = vlaneseq  ;;  %s127_s0 = inlined_call_operand.vmem [shape: f32[8,16], index: 0, kind: input, shape index: {}]   ;;  %s128_s1 = inlined_call_operand.vmem [shape: s32[8,1], index: 1, kind: input, shape index: {}]   ;;  %s129_s2 = inlined_call_operand.vmem [shape: f32[1,16], index: 2, kind: input, shape index: {}]   ;;  %s130_s3 = inlined_call_operand.vmem [shape: f32[1,1,128], index: 3, kind: output, shape index: {}]  }
   0x1   :  { %v14_v0 = vld [vmem:[%s127_s0] sm:$0xff]  ;;  %84 = vset.pattern.permute.xlu0 %v89_v1 }
   0x2   :  { %v18_v2 = vsel %vm17_vm0, %v14_v0, -inf  ;;  %v15_v3 = vld [vmem:[%s128_s1] sm:$0xff]  ;;  %v31_v8 = vand.u32 127, %v30_v7  ;;  %v51_v15 = vsel %vm17_vm0, %v14_v0, 0.0 }
   0x3   :  { %19 = vmax.xlane.f32.xlu0 %v18_v2  ;;  %v82_v14 = vld [vmem:[%s129_s2] ss:$0 sm:$0xff] }
   0x4   :  { %vm72_vm2 = vcmp.eq.s32.totalorder %v31_v8, 0  ;;  %vm74_vm3 = vcmp.eq.s32.totalorder %v31_v8, 1 }
  0x19   :  { %33 = vperm.xlu0 %84, %v15_v3  }
  0x90   :  { %v20_v4 = vpop.xlane.xlu0 %19 }
  0x91   :  { %v21_v5 = vsub.f32 %v14_v0, %v20_v4 }
  0x93   :  { %v22_v6 = vmul.f32 1.442695, %v21_v5 }
  0x95   :  { %85 = vpow2.f32 %v22_v6 }
  0x98   :  { %v34_v9 = vpop.permute.xlu0 %33 }
  0x99   :  { %vm35_vm1 = vcmp.eq.s32.totalorder %v31_v8, %v34_v9 }
  0x9a   :  { %v36_v11 = vsel %vm35_vm1, %v14_v0, 0.0  ;;  %v46_v16 = vsel %vm35_vm1, %v82_v14, 0.0 }
  0x9b   :  { %v37_v13 = vsel %vm17_vm0, %v36_v11, 0.0  ;;  %v47_v17 = vsel %vm17_vm0, %v46_v16, 0.0 }
  0x9f   :  { %v86_v10 = vpop.eup %85 }
  0xa0   :  { %v24_v12 = vsel %vm17_vm0, %v86_v10, 0.0 }
  0xa1   :  { %25 = vadd.xlane.f32.xlu1 %v24_v12 }
  0xa5   :  { %38 = vadd.xlane.f32.xlu1 %v37_v13 }
  0xa9   :  { %52 = vadd.xlane.f32.xlu1 %v51_v15 }
  0xad   :  { %48 = vadd.xlane.f32.xlu1 %v47_v17 }
 0x12e   :  { %v26_v18 = vpop.xlane.xlu1 %25 }
 0x12f   :  { %87 = vlog2.f32 %v26_v18 }
 0x132   :  { %v39_v19 = vpop.xlane.xlu1 %38 }
 0x136   :  { %v53_v20 = vpop.xlane.xlu1 %52 }
 0x137   :  { %v54_v23 = vmul.f32 0.0625, %v53_v20 }
 0x139   :  { %v88_v21 = vpop.eup %87 }
 0x13a   :  { %v28_v22 = vmul.f32 0.6931472, %v88_v21  ;;  %v49_v24 = vpop.xlane.xlu1 %48 }
 0x13b   :  { %v66_v25 = vrot.slane %v49_v24, 4 }
 0x13c   :  { %v29_v26 = vadd.f32 %v28_v22, %v20_v4 }
 0x13d   :  { %v67_v29 = vadd.f32 %v66_v25, %v49_v24 }
 0x13e   :  { %v50_v27 = vsub.f32 %v29_v26, %v39_v19  ;;  %v55_v28 = vsub.f32 %v29_v26, %v54_v23 }
 0x13f   :  { %v68_v33 = vrot.slane %v67_v29, 2 }
 0x140   :  { %v56_v30 = vmul.f32 0.95, %v50_v27  ;;  %v58_v31 = vmul.f32 0.05, %v55_v28 }
 0x141   :  { %v69_v36 = vadd.f32 %v68_v33, %v67_v29 }
 0x142   :  { %v57_v32 = vmul.f32 %v56_v30, %v49_v24 }
 0x143   :  { %v70_v39 = vrot.slane %v69_v36, 1 }
 0x144   :  { %v59_v34 = vadd.f32 %v58_v31, %v57_v32 }
 0x145   :  { %v71_v42 = vadd.f32 %v70_v39, %v69_v36 }
 0x146   :  { %v60_v35 = vrot.slane %v59_v34, 4 }
 0x147   :  { %v75_v45 = vsel %vm74_vm3, %v71_v42, 0.0 }
 0x148   :  { %v61_v37 = vadd.f32 %v60_v35, %v59_v34 }
 0x14a   :  { %v62_v38 = vrot.slane %v61_v37, 2 }
 0x14c   :  { %v63_v40 = vadd.f32 %v62_v38, %v61_v37 }
 0x14e   :  { %v64_v41 = vrot.slane %v63_v40, 1 }
 0x150   :  { %v65_v43 = vadd.f32 %v64_v41, %v63_v40 }
 0x152   :  { %v73_v44 = vsel %vm72_vm2, %v65_v43, 0.0 }
 0x153   :  { %v76_v46 = vadd.f32 %v75_v45, %v73_v44 }
 0x155   :  { %77 = vst [vmem:[%s130_s3] sm:$0x1] %v76_v46 }

</bundles_post_ra>
